<compile_context>
chip_gen: v5e
topology: v5e:2x2
jax: 0.10.0
libtpu: 0.0.40
codegen_flags: <defaults>
</compile_context>

<pallas_src>
import functools

import jax
import jax.numpy as jnp
from jax.experimental import pallas as pl
from jax.experimental.pallas import tpu as pltpu

LOG_SIG_MAX = 2.0
LOG_SIG_MIN = -20.0
EPS_ATT = 1e-6          # torch.ones_like(w) / 1e6
MU = 0.01               # MoELayer default mu
NUM_EXPERTS = 3
LANE = 128              # padded expert dim (E*H=96 -> 128) and output-slab width
NEG_BIG = -1e30         # softmax mask value for padded expert lanes

# row-block indices inside the packed [8*128, 128] weight slab
_W2, _W3, _EW1, _EW2, _SEGSUM, _SEGEXP, _FOLD, _WHEAD = range(8)


def _round_up(x, m):
    return ((x + m - 1) // m) * m


def policy_kernel(obs_ref, wfirst_ref, wslab_ref, kvbd_ref, bias_ref, out_ref,
                  *, action_size, num_experts):
    f32 = jnp.float32
    E = num_experts
    A = action_size

    def wblk(i):                      # static [128,128] view into the weight slab
        return wslab_ref[i * LANE:(i + 1) * LANE, :]

    b1 = bias_ref[0:1, :]
    b2 = bias_ref[1:2, :]
    b3 = bias_ref[2:3, :]
    eb1 = bias_ref[3:4, :]
    eb2 = bias_ref[4:5, :]
    bh = bias_ref[5:6, :]

    # --- fused linear1 + task-query projection: one [B, obs] @ [obs, 256] ---
    # cols [0:128] = one-hot @ tiled task queries (q per expert segment),
    # cols [128:256] = features @ W1 (zero-padded beyond H).
    z0 = jnp.dot(obs_ref[...], wfirst_ref[...], preferred_element_type=f32)
    q_tiled = z0[:, :LANE]
    x = jnp.maximum(z0[:, LANE:] + b1, 0.0)

    # --- backbone L2/L3 (weights padded to 128x128, zero rows/cols beyond H) ---
    x = jnp.maximum(jnp.dot(x, wblk(_W2), preferred_element_type=f32) + b2, 0.0)
    x = jnp.maximum(jnp.dot(x, wblk(_W3), preferred_element_type=f32) + b3, 0.0)

    # --- fused MoE experts (4th expert segment is an all-zero pad) ---
    h = jnp.maximum(jnp.dot(x, wblk(_EW1), preferred_element_type=f32) + eb1, 0.0)
    h = jnp.maximum(jnp.dot(h, wblk(_EW2), preferred_element_type=f32) + eb2, 0.0)

    # --- keys | values in a single MXU pass ---
    kv = jnp.dot(h, kvbd_ref[...], preferred_element_type=f32)     # [TB, 256]
    keys = kv[:, :LANE]
    vals = kv[:, LANE:]
    tb = vals.shape[0]

    # --- per-expert segment reductions (value sq-norms & attention scores), fused ---
    combined = jnp.concatenate([vals * vals, keys * q_tiled], axis=0)   # [2TB, 128]
    red = jnp.dot(combined, wblk(_SEGSUM), preferred_element_type=f32)  # lanes >= E are 0
    nrm2 = red[:tb]
    scores = red[tb:]

    lane = jax.lax.broadcasted_iota(jnp.int32, (tb, LANE), 1)
    valid = lane < E

    # --- softmax over the E real experts (exact divide, off the MXU path) ---
    masked = jnp.where(valid, scores, NEG_BIG)
    m = jnp.max(masked, axis=-1, keepdims=True)
    ex = jnp.exp(masked - m)
    w = ex / jnp.sum(ex, axis=-1, keepdims=True)           # lanes >= E are exactly 0
    reg_base = -(1.0 / E) * MU * jnp.sum(
        jnp.where(valid, jnp.log(w + EPS_ATT), 0.0), axis=-1, keepdims=True)

    # --- F.normalize inverse norms; fuse both segment expansions in one pass ---
    # (garbage in inv lanes >= E multiplies all-zero SEGEXP rows -> exact)
    inv = jax.lax.rsqrt(jnp.maximum(nrm2, 1e-24))          # 1/max(||v||, 1e-12)
    expd = jnp.dot(jnp.concatenate([inv, w], axis=0), wblk(_SEGEXP),
                   preferred_element_type=f32)             # [2TB, 128]
    normalized = vals * expd[:tb]
    tower = vals * expd[tb:]

    # --- per-sample sum_{i<j} <n_i, n_j> = 0.5*(||sum_e n_e||^2 - sum_e ||n_e||^2) ---
    nsum = jnp.dot(normalized, wblk(_FOLD), preferred_element_type=f32)
    t1 = jnp.sum(nsum * nsum, axis=-1, keepdims=True)
    t2 = jnp.sum(normalized * normalized, axis=-1, keepdims=True)
    pair = 0.5 * (t1 - t2)                                  # [TB, 1]

    # --- fused heads -> single lane-dense [TB, 128] slab ---
    # cols [0:A]=mean, [A:2A]=clamped log_std, col 2A = per-sample reg base,
    # col 2A+1 = per-sample pair-sum (batch reduction finished in the epilogue).
    slab = jnp.dot(tower, wblk(_WHEAD), preferred_element_type=f32) + bh
    is_ls = (lane >= A) & (lane < 2 * A)
    slab = jnp.where(is_ls, jnp.clip(slab, LOG_SIG_MIN, LOG_SIG_MAX), slab)
    slab = jnp.where(lane == 2 * A, reg_base, slab)
    slab = jnp.where(lane == 2 * A + 1, pair, slab)
    out_ref[...] = slab


def init_params(key, obs_size, action_size, hidden_dim, num_tasks, num_experts=NUM_EXPERTS):
    """Parameter init mirroring the module's __init__: Linear layers get
    xavier_uniform weight + zero bias, MoE query/key/value params are randn."""
    feat = obs_size - num_tasks

    def xavier(k, fan_in, fan_out):
        a = (6.0 / (fan_in + fan_out)) ** 0.5
        return jax.random.uniform(k, (fan_in, fan_out), jnp.float32, -a, a)

    ks = jax.random.split(key, 16)
    p = {}
    p["w1"] = xavier(ks[0], feat, hidden_dim)
    p["b1"] = jnp.zeros((1, hidden_dim), jnp.float32)
    p["w2"] = xavier(ks[1], hidden_dim, hidden_dim)
    p["b2"] = jnp.zeros((1, hidden_dim), jnp.float32)
    p["w3"] = xavier(ks[2], hidden_dim, hidden_dim)
    p["b3"] = jnp.zeros((1, hidden_dim), jnp.float32)

    p["ew1"] = jnp.stack([xavier(k, hidden_dim, hidden_dim)
                          for k in jax.random.split(ks[3], num_experts)])
    p["eb1"] = jnp.zeros((num_experts, hidden_dim), jnp.float32)
    p["ew2"] = jnp.stack([xavier(k, hidden_dim, hidden_dim)
                          for k in jax.random.split(ks[4], num_experts)])
    p["eb2"] = jnp.zeros((num_experts, hidden_dim), jnp.float32)

    p["task_queries"] = jax.random.normal(ks[5], (num_tasks, hidden_dim), jnp.float32)
    p["key_mats"] = jax.random.normal(ks[6], (num_experts, hidden_dim, hidden_dim), jnp.float32)
    p["val_mats"] = jax.random.normal(ks[7], (num_experts, hidden_dim, hidden_dim), jnp.float32)

    p["mean_w"] = xavier(ks[8], hidden_dim, action_size)
    p["mean_b"] = jnp.zeros((1, action_size), jnp.float32)
    p["ls_w"] = xavier(ks[9], hidden_dim, action_size)
    p["ls_b"] = jnp.zeros((1, action_size), jnp.float32)
    return p


def fuse_params(params):
    """One-time host-side fusion/packing of all weights into 4 lane-dense,
    128-lane-padded arrays (5 kernel inputs total incl. obs)."""
    f32 = jnp.float32
    E = params["ew1"].shape[0]
    feat, H = params["w1"].shape
    T = params["task_queries"].shape[0]
    A = params["mean_w"].shape[1]
    assert E * H <= LANE and H <= LANE and 2 * A + 2 <= LANE

    # fused first layer [obs_size, 256]: cols [0:128] one-hot->tiled task query,
    # cols [128:256] features->linear1 (padded beyond H)
    wfirst = jnp.zeros((feat + T, 2 * LANE), f32)
    wfirst = wfirst.at[feat:, :E * H].set(jnp.tile(params["task_queries"], (1, E)))
    wfirst = wfirst.at[:feat, LANE:LANE + H].set(params["w1"])

    def pad_block(x):
        out = jnp.zeros((LANE, LANE), f32)
        return out.at[:x.shape[0], :x.shape[1]].set(x)

    def block_diag(mats):
        out = jnp.zeros((LANE, LANE), f32)
        for e in range(E):
            out = out.at[e * H:(e + 1) * H, e * H:(e + 1) * H].set(mats[e])
        return out

    w2p = pad_block(params["w2"])
    w3p = pad_block(params["w3"])
    ew1p = pad_block(jnp.concatenate([params["ew1"][e] for e in range(E)], axis=1))
    ew2bd = block_diag(params["ew2"])

    segsum = jnp.zeros((LANE, LANE), f32)   # per-expert segment sum    [EHp -> E]
    segexp = jnp.zeros((LANE, LANE), f32)   # per-expert segment expand [E -> EHp]
    foldp = jnp.zeros((LANE, LANE), f32)    # sum over experts per hidden index
    for e in range(E):
        segsum = segsum.at[e * H:(e + 1) * H, e].set(1.0)
        segexp = segexp.at[e, e * H:(e + 1) * H].set(1.0)
        foldp = foldp.at[e * H:(e + 1) * H, :H].set(jnp.eye(H, dtype=f32))

    wh_seg = (jnp.zeros((H, LANE), f32)
              .at[:, :A].set(params["mean_w"])
              .at[:, A:2 * A].set(params["ls_w"]))
    whead = jnp.zeros((LANE, LANE), f32)
    for e in range(E):
        whead = whead.at[e * H:(e + 1) * H, :].set(wh_seg)

    # one [1024, 128] weight slab => one resident DMA for all 128-wide weights
    wslab = jnp.concatenate(
        [w2p, w3p, ew1p, ew2bd, segsum, segexp, foldp, whead], axis=0)

    # keys|values block-diagonal weight fused into one [128, 256] matmul operand
    kvbd = jnp.concatenate([block_diag(params["key_mats"]),
                            block_diag(params["val_mats"])], axis=1)

    # all biases in one [8, 128] slab
    bias = jnp.zeros((8, LANE), f32)
    bias = bias.at[0, :H].set(params["b1"].reshape(-1))
    bias = bias.at[1, :H].set(params["b2"].reshape(-1))
    bias = bias.at[2, :H].set(params["b3"].reshape(-1))
    bias = bias.at[3, :E * H].set(params["eb1"].reshape(-1))
    bias = bias.at[4, :E * H].set(params["eb2"].reshape(-1))
    bias = (bias.at[5, :A].set(params["mean_b"].reshape(-1))
                .at[5, A:2 * A].set(params["ls_b"].reshape(-1)))

    return {"wfirst": wfirst, "wslab": wslab, "kvbd": kvbd, "bias": bias,
            "action_size": int(A), "num_experts": int(E)}


def debug_gaussian_policy_forward(obs, fused, num_tasks=10):
    """forward(obs) -> (mean, log_std, reg_loss).  The last `num_tasks` dims of
    obs are the one-hot task id (handled inside the fused first-layer weight)."""
    del num_tasks
    obs = obs.astype(jnp.float32)
    B, obs_size = obs.shape
    assert obs_size == fused["wfirst"].shape[0]
    A = fused["action_size"]
    E = fused["num_experts"]

    tile_b = min(512, _round_up(B, 8))
    bp = _round_up(B, tile_b)
    obs_p = obs if bp == B else jnp.pad(obs, ((0, bp - B), (0, 0)))

    kernel = functools.partial(policy_kernel, action_size=A, num_experts=E)
    const2 = lambda i: (0, 0)   # weights: DMA'd once, stay VMEM-resident
    slab = pl.pallas_call(
        kernel,
        out_shape=jax.ShapeDtypeStruct((bp, LANE), jnp.float32),
        grid=(bp // tile_b,),
        in_specs=[
            pl.BlockSpec((tile_b, obs_size), lambda i: (i, 0)),
            pl.BlockSpec(fused["wfirst"].shape, const2),
            pl.BlockSpec(fused["wslab"].shape, const2),
            pl.BlockSpec(fused["kvbd"].shape, const2),
            pl.BlockSpec(fused["bias"].shape, const2),
        ],
        out_specs=pl.BlockSpec((tile_b, LANE), lambda i: (i, 0)),
        compiler_params=pltpu.CompilerParams(
            dimension_semantics=("parallel",)),   # shards batch tiles on v7x's 2 TCs
    )(obs_p, fused["wfirst"], fused["wslab"], fused["kvbd"], fused["bias"])

    slab = slab[:B]
    mean = slab[:, :A]
    log_std = slab[:, A:2 * A]
    reg_base = slab[:, 2 * A]
    pair_sums = slab[:, 2 * A + 1]

    # epilogue: batch-global cosine-similarity scalar (two-pass reduction)
    n_pairs = E * (E - 1) // 2
    similarity = jnp.sum(pair_sums) / float(n_pairs * B)
    reg_loss = reg_base + MU * jnp.abs(similarity)
    return mean, log_std, reg_loss


if __name__ == "__main__":
    NUM_TASKS = 10
    OBS_SIZE = 22          # 12 real features + 10-dim one-hot task id
    ACTION_SIZE = 4
    HIDDEN = 32
    BATCH = 8

    key = jax.random.PRNGKey(0)
    k_param, k_obs = jax.random.split(key)
    params = init_params(k_param, OBS_SIZE, ACTION_SIZE, HIDDEN, NUM_TASKS)
    fused = fuse_params(params)   # one-time host-side weight fusion / packing

    feat = jax.random.normal(k_obs, (BATCH, OBS_SIZE - NUM_TASKS), jnp.float32)
    task_ids = jnp.arange(BATCH) % NUM_TASKS
    onehot = jax.nn.one_hot(task_ids, NUM_TASKS, dtype=jnp.float32)
    obs = jnp.concatenate([feat, onehot], axis=-1)

    mean, log_std, reg_loss = debug_gaussian_policy_forward(obs, fused, num_tasks=NUM_TASKS)
    jax.block_until_ready((mean, log_std, reg_loss))

    assert mean.shape == (BATCH, ACTION_SIZE)
    assert log_std.shape == (BATCH, ACTION_SIZE)
    assert reg_loss.shape == (BATCH,)
    assert bool(jnp.all(jnp.isfinite(mean)))
    assert bool(jnp.all(jnp.isfinite(reg_loss)))
    assert bool(jnp.all(log_std >= LOG_SIG_MIN)) and bool(jnp.all(log_std <= LOG_SIG_MAX))
    print("KERNEL_OK")
</pallas_src>

<mosaic_0001>
module attributes {stable_mosaic.version = 11 : i64} {
  func.func @policy_kernel(%arg0: i32, %arg1: memref<8x22xf32, #tpu.memory_space<vmem>>, %arg2: memref<22x256xf32, #tpu.memory_space<vmem>>, %arg3: memref<1024x128xf32, #tpu.memory_space<vmem>>, %arg4: memref<128x256xf32, #tpu.memory_space<vmem>>, %arg5: memref<8x128xf32, #tpu.memory_space<vmem>>, %arg6: memref<8x128xf32, #tpu.memory_space<vmem>>) attributes {dimension_semantics = [#tpu.dimension_semantics<parallel>], iteration_bounds = array<i64: 1>, scalar_prefetch = 0 : i64, scratch_operands = 0 : i64, tpu.core_type = #tpu.core_type<tc>, window_params = [{transform_indices = @transform_0, window_bounds = array<i64: 8, 22>}, {pipeline_mode = #tpu.pipeline_mode<synchronous>, transform_indices = @transform_1, window_bounds = array<i64: 22, 256>}, {pipeline_mode = #tpu.pipeline_mode<synchronous>, transform_indices = @transform_2, window_bounds = array<i64: 1024, 128>}, {pipeline_mode = #tpu.pipeline_mode<synchronous>, transform_indices = @transform_3, window_bounds = array<i64: 128, 256>}, {pipeline_mode = #tpu.pipeline_mode<synchronous>, transform_indices = @transform_4, window_bounds = array<i64: 8, 128>}, {transform_indices = @transform_5, window_bounds = array<i64: 8, 128>}]} {
    %c0 = arith.constant 0 : index
    %c0_0 = arith.constant 0 : index
    %0 = vector.load %arg5[%c0, %c0_0] : memref<8x128xf32, #tpu.memory_space<vmem>>, vector<1x128xf32>
    %c1 = arith.constant 1 : index
    %c0_1 = arith.constant 0 : index
    %1 = vector.load %arg5[%c1, %c0_1] : memref<8x128xf32, #tpu.memory_space<vmem>>, vector<1x128xf32>
    %c2 = arith.constant 2 : index
    %c0_2 = arith.constant 0 : index
    %2 = vector.load %arg5[%c2, %c0_2] : memref<8x128xf32, #tpu.memory_space<vmem>>, vector<1x128xf32>
    %c3 = arith.constant 3 : index
    %c0_3 = arith.constant 0 : index
    %3 = vector.load %arg5[%c3, %c0_3] : memref<8x128xf32, #tpu.memory_space<vmem>>, vector<1x128xf32>
    %c4 = arith.constant 4 : index
    %c0_4 = arith.constant 0 : index
    %4 = vector.load %arg5[%c4, %c0_4] : memref<8x128xf32, #tpu.memory_space<vmem>>, vector<1x128xf32>
    %c5 = arith.constant 5 : index
    %c0_5 = arith.constant 0 : index
    %5 = vector.load %arg5[%c5, %c0_5] : memref<8x128xf32, #tpu.memory_space<vmem>>, vector<1x128xf32>
    %c0_6 = arith.constant 0 : index
    %c0_7 = arith.constant 0 : index
    %6 = vector.load %arg1[%c0_6, %c0_7] : memref<8x22xf32, #tpu.memory_space<vmem>>, vector<8x22xf32>
    %c0_8 = arith.constant 0 : index
    %c0_9 = arith.constant 0 : index
    %7 = vector.load %arg2[%c0_8, %c0_9] : memref<22x256xf32, #tpu.memory_space<vmem>>, vector<22x256xf32>
    %cst = arith.constant dense<0.000000e+00> : vector<8x256xf32>
    %8 = tpu.matmul %6, %7, %cst {dimension_numbers = #tpu.dot_dimension_numbers<[1], [0], [0], [1], [0, 0, 1, 1], [], []>} : vector<8x22xf32>, vector<22x256xf32>, vector<8x256xf32> -> vector<8x256xf32>
    %9 = vector.extract_strided_slice %8 {offsets = [0, 0], sizes = [8, 128], strides = [1, 1]} : vector<8x256xf32> to vector<8x128xf32>
    %10 = vector.extract_strided_slice %8 {offsets = [0, 128], sizes = [8, 128], strides = [1, 1]} : vector<8x256xf32> to vector<8x128xf32>
    %11 = vector.broadcast %0 : vector<1x128xf32> to vector<8x128xf32>
    %12 = arith.addf %10, %11 : vector<8x128xf32>
    %cst_10 = arith.constant 0.000000e+00 : f32
    %13 = vector.broadcast %cst_10 : f32 to vector<8x128xf32>
    %14 = arith.maximumf %12, %13 : vector<8x128xf32>
    %c0_11 = arith.constant 0 : index
    %c0_12 = arith.constant 0 : index
    %15 = vector.load %arg3[%c0_11, %c0_12] : memref<1024x128xf32, #tpu.memory_space<vmem>>, vector<128x128xf32>
    %cst_13 = arith.constant dense<0.000000e+00> : vector<8x128xf32>
    %16 = tpu.matmul %14, %15, %cst_13 {dimension_numbers = #tpu.dot_dimension_numbers<[1], [0], [0], [1], [0, 0, 1, 1], [], []>} : vector<8x128xf32>, vector<128x128xf32>, vector<8x128xf32> -> vector<8x128xf32>
    %17 = vector.broadcast %1 : vector<1x128xf32> to vector<8x128xf32>
    %18 = arith.addf %16, %17 : vector<8x128xf32>
    %cst_14 = arith.constant 0.000000e+00 : f32
    %19 = vector.broadcast %cst_14 : f32 to vector<8x128xf32>
    %20 = arith.maximumf %18, %19 : vector<8x128xf32>
    %c128 = arith.constant 128 : index
    %c0_15 = arith.constant 0 : index
    %21 = vector.load %arg3[%c128, %c0_15] : memref<1024x128xf32, #tpu.memory_space<vmem>>, vector<128x128xf32>
    %cst_16 = arith.constant dense<0.000000e+00> : vector<8x128xf32>
    %22 = tpu.matmul %20, %21, %cst_16 {dimension_numbers = #tpu.dot_dimension_numbers<[1], [0], [0], [1], [0, 0, 1, 1], [], []>} : vector<8x128xf32>, vector<128x128xf32>, vector<8x128xf32> -> vector<8x128xf32>
    %23 = vector.broadcast %2 : vector<1x128xf32> to vector<8x128xf32>
    %24 = arith.addf %22, %23 : vector<8x128xf32>
    %cst_17 = arith.constant 0.000000e+00 : f32
    %25 = vector.broadcast %cst_17 : f32 to vector<8x128xf32>
    %26 = arith.maximumf %24, %25 : vector<8x128xf32>
    %c256 = arith.constant 256 : index
    %c0_18 = arith.constant 0 : index
    %27 = vector.load %arg3[%c256, %c0_18] : memref<1024x128xf32, #tpu.memory_space<vmem>>, vector<128x128xf32>
    %cst_19 = arith.constant dense<0.000000e+00> : vector<8x128xf32>
    %28 = tpu.matmul %26, %27, %cst_19 {dimension_numbers = #tpu.dot_dimension_numbers<[1], [0], [0], [1], [0, 0, 1, 1], [], []>} : vector<8x128xf32>, vector<128x128xf32>, vector<8x128xf32> -> vector<8x128xf32>
    %29 = vector.broadcast %3 : vector<1x128xf32> to vector<8x128xf32>
    %30 = arith.addf %28, %29 : vector<8x128xf32>
    %cst_20 = arith.constant 0.000000e+00 : f32
    %31 = vector.broadcast %cst_20 : f32 to vector<8x128xf32>
    %32 = arith.maximumf %30, %31 : vector<8x128xf32>
    %c384 = arith.constant 384 : index
    %c0_21 = arith.constant 0 : index
    %33 = vector.load %arg3[%c384, %c0_21] : memref<1024x128xf32, #tpu.memory_space<vmem>>, vector<128x128xf32>
    %cst_22 = arith.constant dense<0.000000e+00> : vector<8x128xf32>
    %34 = tpu.matmul %32, %33, %cst_22 {dimension_numbers = #tpu.dot_dimension_numbers<[1], [0], [0], [1], [0, 0, 1, 1], [], []>} : vector<8x128xf32>, vector<128x128xf32>, vector<8x128xf32> -> vector<8x128xf32>
    %35 = vector.broadcast %4 : vector<1x128xf32> to vector<8x128xf32>
    %36 = arith.addf %34, %35 : vector<8x128xf32>
    %cst_23 = arith.constant 0.000000e+00 : f32
    %37 = vector.broadcast %cst_23 : f32 to vector<8x128xf32>
    %38 = arith.maximumf %36, %37 : vector<8x128xf32>
    %c0_24 = arith.constant 0 : index
    %c0_25 = arith.constant 0 : index
    %39 = vector.load %arg4[%c0_24, %c0_25] : memref<128x256xf32, #tpu.memory_space<vmem>>, vector<128x256xf32>
    %cst_26 = arith.constant dense<0.000000e+00> : vector<8x256xf32>
    %40 = tpu.matmul %38, %39, %cst_26 {dimension_numbers = #tpu.dot_dimension_numbers<[1], [0], [0], [1], [0, 0, 1, 1], [], []>} : vector<8x128xf32>, vector<128x256xf32>, vector<8x256xf32> -> vector<8x256xf32>
    %41 = vector.extract_strided_slice %40 {offsets = [0, 0], sizes = [8, 128], strides = [1, 1]} : vector<8x256xf32> to vector<8x128xf32>
    %42 = vector.extract_strided_slice %40 {offsets = [0, 128], sizes = [8, 128], strides = [1, 1]} : vector<8x256xf32> to vector<8x128xf32>
    %43 = arith.mulf %42, %42 : vector<8x128xf32>
    %44 = arith.mulf %41, %9 : vector<8x128xf32>
    %45 = tpu.concatenate %43, %44 in 0 : vector<8x128xf32>, vector<8x128xf32> -> vector<16x128xf32>
    %c512 = arith.constant 512 : index
    %c0_27 = arith.constant 0 : index
    %46 = vector.load %arg3[%c512, %c0_27] : memref<1024x128xf32, #tpu.memory_space<vmem>>, vector<128x128xf32>
    %cst_28 = arith.constant dense<0.000000e+00> : vector<16x128xf32>
    %47 = tpu.matmul %45, %46, %cst_28 {dimension_numbers = #tpu.dot_dimension_numbers<[1], [0], [0], [1], [0, 0, 1, 1], [], []>} : vector<16x128xf32>, vector<128x128xf32>, vector<16x128xf32> -> vector<16x128xf32>
    %48 = vector.extract_strided_slice %47 {offsets = [0, 0], sizes = [8, 128], strides = [1, 1]} : vector<16x128xf32> to vector<8x128xf32>
    %49 = vector.extract_strided_slice %47 {offsets = [8, 0], sizes = [8, 128], strides = [1, 1]} : vector<16x128xf32> to vector<8x128xf32>
    %50 = tpu.iota {dimensions = array<i32: 1>} : vector<8x128xi32>
    %c3_i32 = arith.constant 3 : i32
    %51 = vector.broadcast %c3_i32 : i32 to vector<8x128xi32>
    %52 = arith.cmpi slt, %50, %51 : vector<8x128xi32>
    %cst_29 = arith.constant -1.000000e+30 : f32
    %53 = vector.broadcast %cst_29 : f32 to vector<8x128xf32>
    %54 = arith.select %52, %49, %53 : vector<8x128xi1>, vector<8x128xf32>
    %cst_30 = arith.constant dense<0xFF800000> : vector<8xf32>
    %55 = vector.multi_reduction <maximumf>, %54, %cst_30 [1] : vector<8x128xf32> to vector<8xf32>
    %56 = vector.shape_cast %55 : vector<8xf32> to vector<8x1xf32>
    %57 = vector.broadcast %56 : vector<8x1xf32> to vector<8x128xf32>
    %58 = arith.subf %54, %57 : vector<8x128xf32>
    %59 = math.exp %58 : vector<8x128xf32>
    %cst_31 = arith.constant dense<0.000000e+00> : vector<8xf32>
    %60 = vector.multi_reduction <add>, %59, %cst_31 [1] : vector<8x128xf32> to vector<8xf32>
    %61 = vector.shape_cast %60 : vector<8xf32> to vector<8x1xf32>
    %62 = vector.broadcast %61 : vector<8x1xf32> to vector<8x128xf32>
    %63 = arith.divf %59, %62 : vector<8x128xf32>
    %cst_32 = arith.constant 9.99999997E-7 : f32
    %64 = vector.broadcast %cst_32 : f32 to vector<8x128xf32>
    %65 = arith.addf %63, %64 : vector<8x128xf32>
    %66 = math.log %65 : vector<8x128xf32>
    %cst_33 = arith.constant 0.000000e+00 : f32
    %67 = vector.broadcast %cst_33 : f32 to vector<8x128xf32>
    %68 = arith.select %52, %66, %67 : vector<8x128xi1>, vector<8x128xf32>
    %cst_34 = arith.constant dense<0.000000e+00> : vector<8xf32>
    %69 = vector.multi_reduction <add>, %68, %cst_34 [1] : vector<8x128xf32> to vector<8xf32>
    %70 = vector.shape_cast %69 : vector<8xf32> to vector<8x1xf32>
    %cst_35 = arith.constant -0.00333333341 : f32
    %71 = vector.broadcast %cst_35 : f32 to vector<8x1xf32>
    %72 = arith.mulf %71, %70 : vector<8x1xf32>
    %cst_36 = arith.constant 1.000000e-24 : f32
    %73 = vector.broadcast %cst_36 : f32 to vector<8x128xf32>
    %74 = arith.maximumf %48, %73 : vector<8x128xf32>
    %75 = math.rsqrt %74 : vector<8x128xf32>
    %76 = tpu.concatenate %75, %63 in 0 : vector<8x128xf32>, vector<8x128xf32> -> vector<16x128xf32>
    %c640 = arith.constant 640 : index
    %c0_37 = arith.constant 0 : index
    %77 = vector.load %arg3[%c640, %c0_37] : memref<1024x128xf32, #tpu.memory_space<vmem>>, vector<128x128xf32>
    %cst_38 = arith.constant dense<0.000000e+00> : vector<16x128xf32>
    %78 = tpu.matmul %76, %77, %cst_38 {dimension_numbers = #tpu.dot_dimension_numbers<[1], [0], [0], [1], [0, 0, 1, 1], [], []>} : vector<16x128xf32>, vector<128x128xf32>, vector<16x128xf32> -> vector<16x128xf32>
    %79 = vector.extract_strided_slice %78 {offsets = [0, 0], sizes = [8, 128], strides = [1, 1]} : vector<16x128xf32> to vector<8x128xf32>
    %80 = arith.mulf %42, %79 : vector<8x128xf32>
    %81 = vector.extract_strided_slice %78 {offsets = [8, 0], sizes = [8, 128], strides = [1, 1]} : vector<16x128xf32> to vector<8x128xf32>
    %82 = arith.mulf %42, %81 : vector<8x128xf32>
    %c768 = arith.constant 768 : index
    %c0_39 = arith.constant 0 : index
    %83 = vector.load %arg3[%c768, %c0_39] : memref<1024x128xf32, #tpu.memory_space<vmem>>, vector<128x128xf32>
    %cst_40 = arith.constant dense<0.000000e+00> : vector<8x128xf32>
    %84 = tpu.matmul %80, %83, %cst_40 {dimension_numbers = #tpu.dot_dimension_numbers<[1], [0], [0], [1], [0, 0, 1, 1], [], []>} : vector<8x128xf32>, vector<128x128xf32>, vector<8x128xf32> -> vector<8x128xf32>
    %85 = arith.mulf %84, %84 : vector<8x128xf32>
    %cst_41 = arith.constant dense<0.000000e+00> : vector<8xf32>
    %86 = vector.multi_reduction <add>, %85, %cst_41 [1] : vector<8x128xf32> to vector<8xf32>
    %87 = vector.shape_cast %86 : vector<8xf32> to vector<8x1xf32>
    %88 = arith.mulf %80, %80 : vector<8x128xf32>
    %cst_42 = arith.constant dense<0.000000e+00> : vector<8xf32>
    %89 = vector.multi_reduction <add>, %88, %cst_42 [1] : vector<8x128xf32> to vector<8xf32>
    %90 = vector.shape_cast %89 : vector<8xf32> to vector<8x1xf32>
    %91 = arith.subf %87, %90 : vector<8x1xf32>
    %cst_43 = arith.constant 5.000000e-01 : f32
    %92 = vector.broadcast %cst_43 : f32 to vector<8x1xf32>
    %93 = arith.mulf %92, %91 : vector<8x1xf32>
    %c896 = arith.constant 896 : index
    %c0_44 = arith.constant 0 : index
    %94 = vector.load %arg3[%c896, %c0_44] : memref<1024x128xf32, #tpu.memory_space<vmem>>, vector<128x128xf32>
    %cst_45 = arith.constant dense<0.000000e+00> : vector<8x128xf32>
    %95 = tpu.matmul %82, %94, %cst_45 {dimension_numbers = #tpu.dot_dimension_numbers<[1], [0], [0], [1], [0, 0, 1, 1], [], []>} : vector<8x128xf32>, vector<128x128xf32>, vector<8x128xf32> -> vector<8x128xf32>
    %96 = vector.broadcast %5 : vector<1x128xf32> to vector<8x128xf32>
    %97 = arith.addf %95, %96 : vector<8x128xf32>
    %c4_i32 = arith.constant 4 : i32
    %98 = vector.broadcast %c4_i32 : i32 to vector<8x128xi32>
    %99 = arith.cmpi sge, %50, %98 : vector<8x128xi32>
    %c8_i32 = arith.constant 8 : i32
    %100 = vector.broadcast %c8_i32 : i32 to vector<8x128xi32>
    %101 = arith.cmpi slt, %50, %100 : vector<8x128xi32>
    %102 = arith.andi %99, %101 : vector<8x128xi1>
    %cst_46 = arith.constant -2.000000e+01 : f32
    %cst_47 = arith.constant 2.000000e+00 : f32
    %103 = vector.broadcast %cst_46 : f32 to vector<8x128xf32>
    %104 = arith.maximumf %103, %97 : vector<8x128xf32>
    %105 = vector.broadcast %cst_47 : f32 to vector<8x128xf32>
    %106 = arith.minimumf %105, %104 : vector<8x128xf32>
    %107 = arith.select %102, %106, %97 : vector<8x128xi1>, vector<8x128xf32>
    %c8_i32_48 = arith.constant 8 : i32
    %108 = vector.broadcast %c8_i32_48 : i32 to vector<8x128xi32>
    %109 = arith.cmpi eq, %50, %108 : vector<8x128xi32>
    %110 = vector.shape_cast %72 : vector<8x1xf32> to vector<8x1xf32>
    %111 = vector.broadcast %110 : vector<8x1xf32> to vector<8x128xf32>
    %112 = arith.select %109, %111, %107 : vector<8x128xi1>, vector<8x128xf32>
    %c9_i32 = arith.constant 9 : i32
    %113 = vector.broadcast %c9_i32 : i32 to vector<8x128xi32>
    %114 = arith.cmpi eq, %50, %113 : vector<8x128xi32>
    %115 = vector.shape_cast %93 : vector<8x1xf32> to vector<8x1xf32>
    %116 = vector.broadcast %115 : vector<8x1xf32> to vector<8x128xf32>
    %117 = arith.select %114, %116, %112 : vector<8x128xi1>, vector<8x128xf32>
    %c0_49 = arith.constant 0 : index
    %c0_50 = arith.constant 0 : index
    %118 = vector.load %arg6[%c0_49, %c0_50] : memref<8x128xf32, #tpu.memory_space<vmem>>, vector<8x128xf32>
    tpu.vector_store %arg6[%c0_49, %c0_50], %117 {strides = array<i32>} : memref<8x128xf32, #tpu.memory_space<vmem>>, vector<8x128xf32>,
    return
  }
  func.func @transform_0(%arg0: i32) -> (i32, i32) {
    %c0_i32 = arith.constant 0 : i32
    %c0_i32_0 = arith.constant 0 : i32
    return %arg0, %c0_i32 : i32, i32
  }
  func.func @transform_1(%arg0: i32) -> (i32, i32) {
    %c0_i32 = arith.constant 0 : i32
    %c0_i32_0 = arith.constant 0 : i32
    %c0_i32_1 = arith.constant 0 : i32
    return %c0_i32, %c0_i32_0 : i32, i32
  }
  func.func @transform_2(%arg0: i32) -> (i32, i32) {
    %c0_i32 = arith.constant 0 : i32
    %c0_i32_0 = arith.constant 0 : i32
    %c0_i32_1 = arith.constant 0 : i32
    return %c0_i32, %c0_i32_0 : i32, i32
  }
  func.func @transform_3(%arg0: i32) -> (i32, i32) {
    %c0_i32 = arith.constant 0 : i32
    %c0_i32_0 = arith.constant 0 : i32
    %c0_i32_1 = arith.constant 0 : i32
    return %c0_i32, %c0_i32_0 : i32, i32
  }
  func.func @transform_4(%arg0: i32) -> (i32, i32) {
    %c0_i32 = arith.constant 0 : i32
    %c0_i32_0 = arith.constant 0 : i32
    %c0_i32_1 = arith.constant 0 : i32
    return %c0_i32, %c0_i32_0 : i32, i32
  }
  func.func @transform_5(%arg0: i32) -> (i32, i32) {
    %c0_i32 = arith.constant 0 : i32
    %c0_i32_0 = arith.constant 0 : i32
    return %arg0, %c0_i32 : i32, i32
  }
}

</mosaic_0001>

<bundles_post_ra>
// kernel: tpu_custom_call.1
= control target key start
LH: loop header
LB: loop body
LE: loop exit
PB: predicated region body
PF: predicated region fallthrough
CT: control target
= control target key end

     0   :  { %10 = vsyncpa [#allocation3], 0  ;;  %s889_s0 = inlined_call_operand.hbm [shape: f32[8,22], index: 0, kind: input, shape index: {}]   ;;  %s890_s1 = inlined_call_operand.hbm [shape: f32[22,256], index: 1, kind: input, shape index: {}]   ;;  %s891_s2 = inlined_call_operand.hbm [shape: f32[1024,128], index: 2, kind: input, shape index: {}]   ;;  %s892_s3 = inlined_call_operand.hbm [shape: f32[128,256], index: 3, kind: input, shape index: {}]   ;;  %s893_s4 = inlined_call_operand.hbm [shape: f32[8,128], index: 4, kind: input, shape index: {}]   ;;  %s894_s5 = inlined_call_operand.hbm [shape: f32[8,128], index: 5, kind: output, shape index: {}]  }
   0x1   :  { %11 = vsyncpa [#allocation6], 0 }
   0x2   :  { %12 = vsyncpa [#allocation9], 0  ;;  %s29_s20 = sshll.u32 %s890_s1, 4  ;;  %s30_s20 = int_to_ptr.hbm [resolvable:$true] %s29_s20 }
   0x3   :  { %13 = vsyncpa [#allocation4], 0  ;;  %s803_s21 = smov [#allocation5]   ;;  %s55_s25 = sshll.u32 %s892_s3, 4  ;;  %s56_s25 = int_to_ptr.hbm [resolvable:$true] %s55_s25 }
   0x4   :  { %s31_s22 = sshll.u32 %s803_s21, 4  ;;  %s804_s26 = smov 256   ;;  %s32_s22 = int_to_ptr.vmem [resolvable:$true] %s31_s22 }
   0x5   :  { %s805_s27 = smov 16   ;;  %s806_s28 = smov [#allocation8]  }
   0x6   :  { %37 = dma.hbm_to_vmem [thread:$0]  %s30_s20, 768, %s32_s22, [#allocation6], %s804_s26, %s804_s26, %s805_s27  }
   0x7   :  { %s57_s29 = sshll.u32 %s806_s28, 4  ;;  %s19_s7 = sshll.u32 %s889_s0, 4  ;;  %s58_s29 = int_to_ptr.vmem [resolvable:$true] %s57_s29  ;;  %s20_s7 = int_to_ptr.hbm [resolvable:$true] %s19_s7 }
   0x8   :  { %63 = dma.hbm_to_vmem [thread:$0]  %s56_s25, 4096, %s58_s29, [#allocation9], %s804_s26, %s804_s26, %s805_s27  }
   0x9   :  { %s42_s9 = sshll.u32 %s891_s2, 4  ;;  %s807_s10 = smov [#allocation2]   ;;  %s43_s9 = int_to_ptr.hbm [resolvable:$true] %s42_s9 }
   0xa   :  { %s21_s11 = sshll.u32 %s807_s10, 4  ;;  %s808_s3 = smov [#allocation7]   ;;  %s22_s11 = int_to_ptr.vmem [resolvable:$true] %s21_s11 }
   0xb   :  { %24 = dma.hbm_to_vmem [thread:$0]  %s20_s7, 128, %s22_s11, [#allocation3]  }
   0xc   :  { %s44_s12 = sshll.u32 %s808_s3, 4  ;;  %s809_s13 = smov 128   ;;  %s45_s12 = int_to_ptr.vmem [resolvable:$true] %s44_s12 }
   0xd   :  { %s810_s14 = smov 8   ;;  %s69_s16 = sshll.u32 %s893_s4, 4  ;;  %s70_s16 = int_to_ptr.hbm [resolvable:$true] %s69_s16 }
   0xe   :  { %50 = dma.hbm_to_vmem [thread:$0]  %s43_s9, 16384, %s45_s12, [#allocation6], %s809_s13, %s809_s13, %s810_s14  }
   0xf   :  { %s811_s17 = smov [#allocation10]  }
  0x10   :  { %s71_s18 = sshll.u32 %s811_s17, 4  ;;  %s72_s18 = int_to_ptr.vmem [resolvable:$true] %s71_s18 }
  0x11   :  { %74 = dma.hbm_to_vmem [thread:$0]  %s70_s16, 128, %s72_s18, [#allocation9]  }
  0x12   :  { %795 = dma.done.wait [#allocation3], 128  }
  0x13   :  { %796 = vsyncadd [#allocation3], 4294967168 }
  0x14   :  { %797 = dma.done.wait [#allocation6], 17152  }
  0x15   :  { %798 = vsyncadd [#allocation6], 4294950144 }
  0x16   :  { %799 = dma.done.wait [#allocation9], 4224  }
  0x17   :  { %800 = vsyncadd [#allocation9], 4294963072  ;;  %vm112_vm0 = vcmask 1045504   ;;  %v107_v0 = vld [vmem:[#allocation5 + $0x28] sm:$0x3f]  ;;  %v105_v1 = vld [vmem:[#allocation5 + $0x18] sm:$0xff] }
  0x18   :  { %625 = vmatpush.msk.msra.mxu1 %vm112_vm0, %v107_v0  ;;  %v177_v2 = vld [vmem:[#allocation7 + $0x78] sm:$0xff]  ;;  %v176_v3 = vld [vmem:[#allocation7 + $0x70] sm:$0xff]  ;;  %v859_v5 = vld [vmem:[#allocation2] sm:$0xff]  ;;  %vm108_vm1 = vcmask 179200   ;;  %s812_s2 = smov [#allocation11]   ;;  %s611_s21 = sshll.u32 %s894_s5, 4  ;;  %s612_s21 = int_to_ptr.hbm [resolvable:$true] %s611_s21 }
  0x19   :  { %v103_v4 = vld [vmem:[#allocation5 + $0x8] sm:$0xff]  ;;  %179 = vmatpush.msra.mxu2 %v177_v2  ;;  %v175_v6 = vld [vmem:[#allocation7 + $0x68] sm:$0xff]  ;;  %v174_v7 = vld [vmem:[#allocation7 + $0x60] sm:$0xff]  ;;  %s609_s4 = sshll.u32 %s812_s2, 4  ;;  %s610_s4 = int_to_ptr.vmem [resolvable:$true] %s609_s4 }
  0x1a   :  { %153 = vmatpush.msra.mxu1 %v105_v1  ;;  %v173_v8 = vld [vmem:[#allocation7 + $0x58] sm:$0xff]  ;;  %v172_v9 = vld [vmem:[#allocation7 + $0x50] sm:$0xff]  ;;  %v171_v10 = vld [vmem:[#allocation7 + $0x48] sm:$0xff] }
  0x1b   :  { %180 = vmatpush.msra.mxu2 %v176_v3  ;;  %v170_v11 = vld [vmem:[#allocation7 + $0x40] sm:$0xff]  ;;  %v169_v12 = vld [vmem:[#allocation7 + $0x38] sm:$0xff]  ;;  %v168_v13 = vld [vmem:[#allocation7 + $0x30] sm:$0xff] }
  0x1c   :  { %154 = vmatpush.msra.mxu1 %v103_v4  ;;  %v167_v14 = vld [vmem:[#allocation7 + $0x28] sm:$0xff]  ;;  %v166_v15 = vld [vmem:[#allocation7 + $0x20] sm:$0xff]  ;;  %v165_v16 = vld [vmem:[#allocation7 + $0x18] sm:$0xff] }
  0x1d   :  { %626 = vmatmul.msk.f32.vlgmr.msra.gmra.mxu1 %vm108_vm1, %v859_v5  ;;  %181 = vmatpush.msra.mxu2 %v175_v6  ;;  %v164_v17 = vld [vmem:[#allocation7 + $0x10] sm:$0xff]  ;;  %v163_v18 = vld [vmem:[#allocation7 + $0x8] sm:$0xff]  ;;  %v162_v19 = vld [vmem:[#allocation7] sm:$0xff] }
  0x1e   :  { %v215_v20 = vld [vmem:[#allocation7 + $0xf8] sm:$0xff]  ;;  %v214_v21 = vld [vmem:[#allocation7 + $0xf0] sm:$0xff]  ;;  %v213_v22 = vld [vmem:[#allocation7 + $0xe8] sm:$0xff] }
  0x1f   :  { %182 = vmatpush.msra.mxu2 %v174_v7  ;;  %217 = vmatpush.msra.mxu3 %v215_v20  ;;  %v212_v23 = vld [vmem:[#allocation7 + $0xe0] sm:$0xff]  ;;  %v211_v24 = vld [vmem:[#allocation7 + $0xd8] sm:$0xff]  ;;  %v210_v25 = vld [vmem:[#allocation7 + $0xd0] sm:$0xff] }
  0x20   :  { %v209_v26 = vld [vmem:[#allocation7 + $0xc8] sm:$0xff]  ;;  %v208_v27 = vld [vmem:[#allocation7 + $0xc0] sm:$0xff]  ;;  %v207_v28 = vld [vmem:[#allocation7 + $0xb8] sm:$0xff] }
  0x21   :  { %183 = vmatpush.msra.mxu2 %v173_v8  ;;  %218 = vmatpush.msra.mxu3 %v214_v21  ;;  %v206_v29 = vld [vmem:[#allocation7 + $0xb0] sm:$0xff]  ;;  %v205_v30 = vld [vmem:[#allocation7 + $0xa8] sm:$0xff]  ;;  %v204_v31 = vld [vmem:[#allocation7 + $0xa0] sm:$0xff] }
  0x22   :  { %v203_v32 = vld [vmem:[#allocation7 + $0x98] sm:$0xff]  ;;  %v637_v33 = vld [vmem:[#allocation10] ss:$0 sm:$0xff]  ;;  %v202_v37 = vld [vmem:[#allocation7 + $0x90] sm:$0xff] }
  0x23   :  { %184 = vmatpush.msra.mxu2 %v172_v9  ;;  %219 = vmatpush.msra.mxu3 %v213_v22  ;;  %v201_v38 = vld [vmem:[#allocation7 + $0x88] sm:$0xff]  ;;  %v200_v39 = vld [vmem:[#allocation7 + $0x80] sm:$0xff]  ;;  %v106_v40 = vld [vmem:[#allocation5 + $0x20] sm:$0x3f] }
  0x24   :  { %v104_v41 = vld [vmem:[#allocation5 + $0x10] sm:$0xff]  ;;  %623 = vmatpush.msk.msra.mxu0 %vm112_vm0, %v106_v40  ;;  %v102_v42 = vld [vmem:[#allocation5] sm:$0xff]  ;;  %v253_v43 = vld [vmem:[#allocation7 + $0x178] sm:$0xff] }
  0x25   :  { %185 = vmatpush.msra.mxu2 %v171_v10  ;;  %220 = vmatpush.msra.mxu3 %v212_v23  ;;  %v252_v44 = vld [vmem:[#allocation7 + $0x170] sm:$0xff]  ;;  %v251_v45 = vld [vmem:[#allocation7 + $0x168] sm:$0xff]  ;;  %v250_v46 = vld [vmem:[#allocation7 + $0x160] sm:$0xff] }
  0x26   :  { %133 = vmatpush.msra.mxu0 %v104_v41  ;;  %v249_v47 = vld [vmem:[#allocation7 + $0x158] sm:$0xff]  ;;  %v248_v48 = vld [vmem:[#allocation7 + $0x150] sm:$0xff]  ;;  %v247_v49 = vld [vmem:[#allocation7 + $0x148] sm:$0xff] }
  0x27   :  { %186 = vmatpush.msra.mxu2 %v170_v11  ;;  %221 = vmatpush.msra.mxu3 %v211_v24  ;;  %v246_v50 = vld [vmem:[#allocation7 + $0x140] sm:$0xff]  ;;  %v245_v51 = vld [vmem:[#allocation7 + $0x138] sm:$0xff]  ;;  %v244_v52 = vld [vmem:[#allocation7 + $0x130] sm:$0xff] }
  0x28   :  { %134 = vmatpush.msra.mxu0 %v102_v42  ;;  %v243_v53 = vld [vmem:[#allocation7 + $0x128] sm:$0xff]  ;;  %v638_v54 = vld [vmem:[#allocation10 + $0x1] ss:$0 sm:$0xff]  ;;  %v241_v57 = vld [vmem:[#allocation7 + $0x118] sm:$0xff] }
  0x29   :  { %187 = vmatpush.msra.mxu2 %v169_v12  ;;  %222 = vmatpush.msra.mxu3 %v210_v25  ;;  %v242_v55 = vld [vmem:[#allocation7 + $0x120] sm:$0xff]  ;;  %v240_v60 = vld [vmem:[#allocation7 + $0x110] sm:$0xff]  ;;  %v239_v61 = vld [vmem:[#allocation7 + $0x108] sm:$0xff] }
  0x2a   :  { %255 = vmatpush.msrb.mxu0 %v253_v43  ;;  %v238_v62 = vld [vmem:[#allocation7 + $0x100] sm:$0xff]  ;;  %v291_v63 = vld [vmem:[#allocation7 + $0x1f8] sm:$0xff]  ;;  %v290_v0 = vld [vmem:[#allocation7 + $0x1f0] sm:$0xff] }
  0x2b   :  { %188 = vmatpush.msra.mxu2 %v168_v13  ;;  %223 = vmatpush.msra.mxu3 %v209_v26  ;;  %v289_v1 = vld [vmem:[#allocation7 + $0x1e8] sm:$0xff]  ;;  %v288_v2 = vld [vmem:[#allocation7 + $0x1e0] sm:$0xff]  ;;  %v287_v3 = vld [vmem:[#allocation7 + $0x1d8] sm:$0xff] }
  0x2c   :  { %624 = vmatmul.msk.f32.vlgmr.msra.gmra.mxu0 %vm108_vm1, %v859_v5  ;;  %293 = vmatpush.msrb.mxu1 %v291_v63  ;;  %v286_v4 = vld [vmem:[#allocation7 + $0x1d0] sm:$0xff]  ;;  %v285_v5 = vld [vmem:[#allocation7 + $0x1c8] sm:$0xff]  ;;  %v284_v6 = vld [vmem:[#allocation7 + $0x1c0] sm:$0xff] }
  0x2d   :  { %189 = vmatpush.msra.mxu2 %v167_v14  ;;  %224 = vmatpush.msra.mxu3 %v208_v27  ;;  %v283_v7 = vld [vmem:[#allocation7 + $0x1b8] sm:$0xff]  ;;  %v282_v8 = vld [vmem:[#allocation7 + $0x1b0] sm:$0xff]  ;;  %v281_v9 = vld [vmem:[#allocation7 + $0x1a8] sm:$0xff] }
  0x2e   :  { %256 = vmatpush.msrb.mxu0 %v252_v44  ;;  %294 = vmatpush.msrb.mxu1 %v290_v0  ;;  %v280_v10 = vld [vmem:[#allocation7 + $0x1a0] sm:$0xff]  ;;  %v279_v11 = vld [vmem:[#allocation7 + $0x198] sm:$0xff]  ;;  %v343_v22 = vld [vmem:[#allocation8 + $0xe8] sm:$0xff] }
  0x2f   :  { %190 = vmatpush.msra.mxu2 %v166_v15  ;;  %225 = vmatpush.msra.mxu3 %v207_v28  ;;  %v639_v12 = vld [vmem:[#allocation10 + $0x2] ss:$0 sm:$0xff]  ;;  %v345_v20 = vld [vmem:[#allocation8 + $0xf8] sm:$0xff]  ;;  %v340_v23 = vld [vmem:[#allocation8 + $0xd0] sm:$0xff] }
  0x30   :  { %257 = vmatpush.msrb.mxu0 %v251_v45  ;;  %295 = vmatpush.msrb.mxu1 %v289_v1  ;;  %v342_v21 = vld [vmem:[#allocation8 + $0xe0] sm:$0xff]  ;;  %v341_v24 = vld [vmem:[#allocation8 + $0xd8] sm:$0xff]  ;;  %v339_v26 = vld [vmem:[#allocation8 + $0xc8] sm:$0xff] }
  0x31   :  { %191 = vmatpush.msra.mxu2 %v165_v16  ;;  %226 = vmatpush.msra.mxu3 %v206_v29  ;;  %v278_v16 = vld [vmem:[#allocation7 + $0x190] sm:$0xff]  ;;  %v338_v25 = vld [vmem:[#allocation8 + $0xc0] sm:$0xff]  ;;  %v337_v28 = vld [vmem:[#allocation8 + $0xb8] sm:$0xff] }
  0x32   :  { %258 = vmatpush.msrb.mxu0 %v250_v46  ;;  %296 = vmatpush.msrb.mxu1 %v288_v2  ;;  %v336_v27 = vld [vmem:[#allocation8 + $0xb0] sm:$0xff]  ;;  %v334_v29 = vld [vmem:[#allocation8 + $0xa0] sm:$0xff]  ;;  %v325_v41 = vld [vmem:[#allocation8 + $0x58] sm:$0xff] }
  0x33   :  { %192 = vmatpush.msra.mxu2 %v164_v17  ;;  %227 = vmatpush.msra.mxu3 %v205_v30  ;;  %v277_v17 = vld [vmem:[#allocation7 + $0x188] sm:$0xff]  ;;  %v324_v40 = vld [vmem:[#allocation8 + $0x50] sm:$0xff]  ;;  %v322_v42 = vld [vmem:[#allocation8 + $0x40] sm:$0xff] }
  0x34   :  { %259 = vmatpush.msrb.mxu0 %v249_v47  ;;  %297 = vmatpush.msrb.mxu1 %v287_v3  ;;  %v335_v30 = vld [vmem:[#allocation8 + $0xa8] sm:$0xff]  ;;  %v320_v44 = vld [vmem:[#allocation8 + $0x30] sm:$0xff]  ;;  %v321_v45 = vld [vmem:[#allocation8 + $0x38] sm:$0xff] }
  0x35   :  { %193 = vmatpush.msra.mxu2 %v163_v18  ;;  %228 = vmatpush.msra.mxu3 %v204_v31  ;;  %v276_v18 = vld [vmem:[#allocation7 + $0x180] sm:$0xff]  ;;  %v332_v31 = vld [vmem:[#allocation8 + $0x90] sm:$0xff]  ;;  %v323_v43 = vld [vmem:[#allocation8 + $0x48] sm:$0xff] }
  0x36   :  { %260 = vmatpush.msrb.mxu0 %v248_v48  ;;  %298 = vmatpush.msrb.mxu1 %v286_v4  ;;  %v640_v46 = vld [vmem:[#allocation10 + $0x3] ss:$0 sm:$0xff]  ;;  %v395_v0 = vld [vmem:[#allocation7 + $0x238] sm:$0xff]  ;;  %v394_v1 = vld [vmem:[#allocation7 + $0x230] sm:$0xff] }
  0x37   :  { %194 = vmatpush.msra.mxu2 %v162_v19  ;;  %229 = vmatpush.msra.mxu3 %v203_v32  ;;  %v344_v19 = vld [vmem:[#allocation8 + $0xf0] sm:$0xff]  ;;  %v333_v32 = vld [vmem:[#allocation8 + $0x98] sm:$0xff]  ;;  %v396_v63 = vld [vmem:[#allocation7 + $0x240] sm:$0xff] }
  0x38   :  { %261 = vmatpush.msrb.mxu0 %v247_v49  ;;  %299 = vmatpush.msrb.mxu1 %v285_v5  ;;  %v393_v2 = vld [vmem:[#allocation7 + $0x228] sm:$0xff]  ;;  %v392_v3 = vld [vmem:[#allocation7 + $0x220] sm:$0xff]  ;;  %v391_v4 = vld [vmem:[#allocation7 + $0x218] sm:$0xff] }
  0x39   :  { %230 = vmatpush.msra.mxu3 %v202_v37  ;;  %346 = vmatpush.msrb.mxu2 %v344_v19  ;;  %v326_v37 = vld [vmem:[#allocation8 + $0x60] sm:$0xff] }
  0x3a   :  { %262 = vmatpush.msrb.mxu0 %v246_v50  ;;  %300 = vmatpush.msrb.mxu1 %v284_v6  ;;  %v318_v50 = vld [vmem:[#allocation8 + $0x20] sm:$0xff]  ;;  %v390_v6 = vld [vmem:[#allocation7 + $0x210] sm:$0xff] }
  0x3b   :  { %231 = vmatpush.msra.mxu3 %v201_v38  ;;  %347 = vmatpush.msrb.mxu2 %v342_v21  ;;  %v327_v38 = vld [vmem:[#allocation8 + $0x68] sm:$0xff]  ;;  %v641_v5 = vld [vmem:[#allocation10 + $0x4] ss:$0 sm:$0xff]  ;;  %v481_v21 = vld [vmem:[#allocation7 + $0x2d0] sm:$0xff] }
  0x3c   :  { %263 = vmatpush.msrb.mxu0 %v245_v51  ;;  %301 = vmatpush.msrb.mxu1 %v283_v7  ;;  %v319_v51 = vld [vmem:[#allocation8 + $0x28] sm:$0xff] }
  0x3d   :  { %232 = vmatpush.msra.mxu3 %v200_v39  ;;  %348 = vmatpush.msrb.mxu2 %v340_v23  ;;  %v479_v23 = vld [vmem:[#allocation7 + $0x2c0] sm:$0xff] }
  0x3e   :  { %264 = vmatpush.msrb.mxu0 %v244_v52  ;;  %302 = vmatpush.msrb.mxu1 %v282_v8  ;;  %v316_v52 = vld [vmem:[#allocation8 + $0x10] sm:$0xff] }
  0x3f   :  { %366 = vmatpush.msrb.mxu3 %v345_v20  ;;  %349 = vmatpush.msrb.mxu2 %v338_v25  ;;  %v477_v25 = vld [vmem:[#allocation7 + $0x2b0] sm:$0xff] }
  0x40   :  { %265 = vmatpush.msrb.mxu0 %v243_v53  ;;  %303 = vmatpush.msrb.mxu1 %v281_v9  ;;  %v317_v53 = vld [vmem:[#allocation8 + $0x18] sm:$0xff] }
  0x41   :  { %367 = vmatpush.msrb.mxu3 %v343_v22  ;;  %350 = vmatpush.msrb.mxu2 %v336_v27  ;;  %v480_v22 = vld [vmem:[#allocation7 + $0x2c8] sm:$0xff]  ;;  %v475_v27 = vld [vmem:[#allocation7 + $0x2a0] sm:$0xff] }
  0x42   :  { %266 = vmatpush.msrb.mxu0 %v242_v55  ;;  %304 = vmatpush.msrb.mxu1 %v280_v10  ;;  %v315_v55 = vld [vmem:[#allocation8 + $0x8] sm:$0xff] }
  0x43   :  { %368 = vmatpush.msrb.mxu3 %v341_v24  ;;  %351 = vmatpush.msrb.mxu2 %v334_v29  ;;  %v389_v10 = vld [vmem:[#allocation7 + $0x208] sm:$0xff]  ;;  %v478_v24 = vld [vmem:[#allocation7 + $0x2b8] sm:$0xff]  ;;  %v473_v29 = vld [vmem:[#allocation7 + $0x290] sm:$0xff] }
  0x44   :  { %267 = vmatpush.msrb.mxu0 %v241_v57  ;;  %305 = vmatpush.msrb.mxu1 %v279_v11  ;;  %v402_v57 = vld [vmem:[#allocation7 + $0x270] sm:$0xff]  ;;  %v388_v11 = vld [vmem:[#allocation7 + $0x200] sm:$0xff] }
  0x45   :  { %369 = vmatpush.msrb.mxu3 %v339_v26  ;;  %352 = vmatpush.msrb.mxu2 %v332_v31  ;;  %v476_v26 = vld [vmem:[#allocation7 + $0x2a8] sm:$0xff]  ;;  %v471_v31 = vld [vmem:[#allocation7 + $0x280] sm:$0xff] }
  0x46   :  { %268 = vmatpush.msrb.mxu0 %v240_v60  ;;  %306 = vmatpush.msrb.mxu1 %v278_v16  ;;  %v399_v60 = vld [vmem:[#allocation7 + $0x258] sm:$0xff] }
  0x47   :  { %370 = vmatpush.msrb.mxu3 %v337_v28  ;;  %v482_v16 = vld [vmem:[#allocation7 + $0x2d8] sm:$0xff] }
  0x48   :  { %269 = vmatpush.msrb.mxu0 %v239_v61  ;;  %307 = vmatpush.msrb.mxu1 %v277_v17  ;;  %v398_v61 = vld [vmem:[#allocation7 + $0x250] sm:$0xff]  ;;  %v474_v28 = vld [vmem:[#allocation7 + $0x298] sm:$0xff] }
  0x49   :  { %371 = vmatpush.msrb.mxu3 %v335_v30  ;;  %v472_v30 = vld [vmem:[#allocation7 + $0x288] sm:$0xff] }
  0x4a   :  { %270 = vmatpush.msrb.mxu0 %v238_v62  ;;  %308 = vmatpush.msrb.mxu1 %v276_v18  ;;  %v397_v62 = vld [vmem:[#allocation7 + $0x248] sm:$0xff] }
  0x4b   :  { %372 = vmatpush.msrb.mxu3 %v333_v32  ;;  %v527_v32 = vld [vmem:[#allocation7 + $0x378] sm:$0xff] }
  0x9a   :  { %v156_v34 = vpop.f32.mrf.mxu1 }
  0x9b   :  { %v160_v35 = vadd.f32 %v637_v33, %v156_v34  ;;  %v330_v33 = vld [vmem:[#allocation8 + $0x80] sm:$0xff]  ;;  %v331_v34 = vld [vmem:[#allocation8 + $0x88] sm:$0xff] }
  0x9c   :  { %353 = vmatpush.msrb.mxu2 %v330_v33  ;;  %373 = vmatpush.msrb.mxu3 %v331_v34  ;;  %v526_v33 = vld [vmem:[#allocation7 + $0x370] sm:$0xff]  ;;  %v525_v34 = vld [vmem:[#allocation7 + $0x368] sm:$0xff] }
  0x9d   :  { %v161_v36 = vmax.f32 %v160_v35, 0.0  ;;  %v328_v35 = vld [vmem:[#allocation8 + $0x70] sm:$0xff] }
  0x9e   :  { %354 = vmatpush.msrb.mxu2 %v328_v35  ;;  %v524_v35 = vld [vmem:[#allocation7 + $0x360] sm:$0xff] }
  0x9f   :  { %195 = vmatmul.f32.vlgmr.msra.gmra.mxu2 %v161_v36  ;;  %v329_v36 = vld [vmem:[#allocation8 + $0x78] sm:$0xff] }
  0xa0   :  { %374 = vmatpush.msrb.mxu3 %v329_v36  ;;  %355 = vmatpush.msrb.mxu2 %v326_v37  ;;  %v427_v36 = vlaneseq }
  0xa2   :  { %375 = vmatpush.msrb.mxu3 %v327_v38  ;;  %356 = vmatpush.msrb.mxu2 %v324_v40 }
  0xa4   :  { %376 = vmatpush.msrb.mxu3 %v325_v41  ;;  %357 = vmatpush.msrb.mxu2 %v322_v42 }
  0xa6   :  { %377 = vmatpush.msrb.mxu3 %v323_v43  ;;  %358 = vmatpush.msrb.mxu2 %v320_v44 }
  0xa8   :  { %378 = vmatpush.msrb.mxu3 %v321_v45  ;;  %359 = vmatpush.msrb.mxu2 %v318_v50  ;;  %v522_v50 = vld [vmem:[#allocation7 + $0x350] sm:$0xff] }
  0xa9   :  { %v866_v39 = vpop.f32.mrf.mxu0 }
  0xaa   :  { %379 = vmatpush.msrb.mxu3 %v319_v51  ;;  %360 = vmatpush.msrb.mxu2 %v316_v52  ;;  %v521_v51 = vld [vmem:[#allocation7 + $0x348] sm:$0xff]  ;;  %v520_v52 = vld [vmem:[#allocation7 + $0x340] sm:$0xff] }
  0xac   :  { %380 = vmatpush.msrb.mxu3 %v317_v53  ;;  %v519_v53 = vld [vmem:[#allocation7 + $0x338] sm:$0xff] }
  0xae   :  { %381 = vmatpush.msrb.mxu3 %v315_v55  ;;  %v517_v55 = vld [vmem:[#allocation7 + $0x328] sm:$0xff] }
 0x122   :  { %v196_v56 = vpop.f32.mrf.mxu2 }
 0x123   :  { %v197_v58 = vadd.f32 %v638_v54, %v196_v56  ;;  %v314_v54 = vld [vmem:[#allocation8] sm:$0xff]  ;;  %v403_v56 = vld [vmem:[#allocation7 + $0x278] sm:$0xff] }
 0x124   :  { %361 = vmatpush.msrb.mxu2 %v314_v54  ;;  %404 = vmatpush.msra.mxu0 %v403_v56  ;;  %v518_v54 = vld [vmem:[#allocation7 + $0x330] sm:$0xff]  ;;  %v516_v56 = vld [vmem:[#allocation7 + $0x320] sm:$0xff] }
 0x125   :  { %v199_v59 = vmax.f32 %v197_v58, 0.0  ;;  %v401_v58 = vld [vmem:[#allocation7 + $0x268] sm:$0xff] }
 0x126   :  { %405 = vmatpush.msra.mxu0 %v402_v57  ;;  %528 = vmatpush.msra.mxu2 %v527_v32  ;;  %v515_v57 = vld [vmem:[#allocation7 + $0x318] sm:$0xff] }
 0x127   :  { %233 = vmatmul.f32.vlgmr.msra.gmra.mxu3 %v199_v59  ;;  %v400_v59 = vld [vmem:[#allocation7 + $0x260] sm:$0xff] }
 0x128   :  { %406 = vmatpush.msra.mxu0 %v401_v58  ;;  %529 = vmatpush.msra.mxu2 %v526_v33  ;;  %v514_v58 = vld [vmem:[#allocation7 + $0x310] sm:$0xff]  ;;  %v559_v33 = vld [vmem:[#allocation7 + $0x398] sm:$0xff] }
 0x12a   :  { %407 = vmatpush.msra.mxu0 %v400_v59  ;;  %530 = vmatpush.msra.mxu2 %v525_v34  ;;  %v513_v59 = vld [vmem:[#allocation7 + $0x308] sm:$0xff] }
 0x12c   :  { %408 = vmatpush.msra.mxu0 %v399_v60  ;;  %531 = vmatpush.msra.mxu2 %v524_v35  ;;  %v512_v60 = vld [vmem:[#allocation7 + $0x300] sm:$0xff]  ;;  %v558_v35 = vld [vmem:[#allocation7 + $0x390] sm:$0xff] }
 0x12e   :  { %409 = vmatpush.msra.mxu0 %v398_v61 }
 0x130   :  { %410 = vmatpush.msra.mxu0 %v397_v62 }
 0x132   :  { %411 = vmatpush.msra.mxu0 %v396_v63 }
 0x134   :  { %412 = vmatpush.msra.mxu0 %v395_v0 }
 0x136   :  { %413 = vmatpush.msra.mxu0 %v394_v1 }
 0x138   :  { %414 = vmatpush.msra.mxu0 %v393_v2 }
 0x13a   :  { %415 = vmatpush.msra.mxu0 %v392_v3 }
 0x13c   :  { %416 = vmatpush.msra.mxu0 %v391_v4 }
 0x13e   :  { %417 = vmatpush.msra.mxu0 %v390_v6  ;;  %v570_v6 = vld [vmem:[#allocation7 + $0x3f0] sm:$0xff] }
 0x140   :  { %418 = vmatpush.msra.mxu0 %v389_v10 }
 0x142   :  { %419 = vmatpush.msra.mxu0 %v388_v11  ;;  %v568_v11 = vld [vmem:[#allocation7 + $0x3e0] sm:$0xff] }
 0x1aa   :  { %v234_v13 = vpop.f32.mrf.mxu3 }
 0x1ab   :  { %v235_v14 = vadd.f32 %v639_v12, %v234_v13  ;;  %v486_v12 = vld [vmem:[#allocation7 + $0x2f8] sm:$0xff]  ;;  %v485_v13 = vld [vmem:[#allocation7 + $0x2f0] sm:$0xff] }
 0x1ac   :  { %487 = vmatpush.msra.mxu1 %v486_v12 }
 0x1ad   :  { %v237_v15 = vmax.f32 %v235_v14, 0.0  ;;  %v484_v14 = vld [vmem:[#allocation7 + $0x2e8] sm:$0xff] }
 0x1ae   :  { %488 = vmatpush.msra.mxu1 %v485_v13 }
 0x1af   :  { %271 = vmatmul.f32.vlgmr.msrb.gmra.mxu0 %v237_v15  ;;  %v483_v15 = vld [vmem:[#allocation7 + $0x2e0] sm:$0xff] }
 0x1b0   :  { %489 = vmatpush.msra.mxu1 %v484_v14  ;;  %v567_v14 = vld [vmem:[#allocation7 + $0x3d8] sm:$0xff] }
 0x1b2   :  { %490 = vmatpush.msra.mxu1 %v483_v15 }
 0x1b4   :  { %491 = vmatpush.msra.mxu1 %v482_v16 }
 0x1b6   :  { %492 = vmatpush.msra.mxu1 %v481_v21  ;;  %v565_v21 = vld [vmem:[#allocation7 + $0x3c8] sm:$0xff] }
 0x1b8   :  { %493 = vmatpush.msra.mxu1 %v480_v22 }
 0x1ba   :  { %494 = vmatpush.msra.mxu1 %v479_v23  ;;  %v564_v23 = vld [vmem:[#allocation7 + $0x3c0] sm:$0xff] }
 0x1bc   :  { %495 = vmatpush.msra.mxu1 %v478_v24 }
 0x1be   :  { %496 = vmatpush.msra.mxu1 %v477_v25  ;;  %v563_v25 = vld [vmem:[#allocation7 + $0x3b8] sm:$0xff] }
 0x1c0   :  { %497 = vmatpush.msra.mxu1 %v476_v26  ;;  %v562_v26 = vld [vmem:[#allocation7 + $0x3b0] sm:$0xff] }
 0x1c2   :  { %498 = vmatpush.msra.mxu1 %v475_v27  ;;  %v561_v27 = vld [vmem:[#allocation7 + $0x3a8] sm:$0xff] }
 0x1c4   :  { %499 = vmatpush.msra.mxu1 %v474_v28  ;;  %v560_v28 = vld [vmem:[#allocation7 + $0x3a0] sm:$0xff] }
 0x1c6   :  { %500 = vmatpush.msra.mxu1 %v473_v29 }
 0x1c8   :  { %501 = vmatpush.msra.mxu1 %v472_v30 }
 0x1ca   :  { %502 = vmatpush.msra.mxu1 %v471_v31 }
 0x22c   :  { %v272_v47 = vpop.f32.mrf.mxu0 }
 0x22d   :  { %v273_v48 = vadd.f32 %v640_v46, %v272_v47 }
 0x22f   :  { %v275_v49 = vmax.f32 %v273_v48, 0.0 }
 0x231   :  { %309 = vmatmul.f32.vlgmr.msrb.gmra.mxu1 %v275_v49  ;;  %v523_v49 = vld [vmem:[#allocation7 + $0x358] sm:$0xff] }
 0x232   :  { %532 = vmatpush.msra.mxu2 %v523_v49 }
 0x234   :  { %533 = vmatpush.msra.mxu2 %v522_v50 }
 0x236   :  { %534 = vmatpush.msra.mxu2 %v521_v51 }
 0x238   :  { %535 = vmatpush.msra.mxu2 %v520_v52 }
 0x23a   :  { %536 = vmatpush.msra.mxu2 %v519_v53 }
 0x23c   :  { %537 = vmatpush.msra.mxu2 %v518_v54 }
 0x23e   :  { %538 = vmatpush.msra.mxu2 %v517_v55 }
 0x240   :  { %539 = vmatpush.msra.mxu2 %v516_v56 }
 0x242   :  { %540 = vmatpush.msra.mxu2 %v515_v57 }
 0x244   :  { %541 = vmatpush.msra.mxu2 %v514_v58 }
 0x246   :  { %542 = vmatpush.msra.mxu2 %v513_v59 }
 0x248   :  { %543 = vmatpush.msra.mxu2 %v512_v60 }
 0x2ae   :  { %v310_v7 = vpop.f32.mrf.mxu1 }
 0x2af   :  { %v311_v8 = vadd.f32 %v641_v5, %v310_v7  ;;  %v571_v5 = vld [vmem:[#allocation7 + $0x3f8] sm:$0xff] }
 0x2b0   :  { %573 = vmatpush.msra.mxu3 %v571_v5 }
 0x2b1   :  { %v313_v9 = vmax.f32 %v311_v8, 0.0  ;;  %v569_v8 = vld [vmem:[#allocation7 + $0x3e8] sm:$0xff] }
 0x2b2   :  { %574 = vmatpush.msra.mxu3 %v570_v6 }
 0x2b3   :  { %362 = vmatmul.f32.vlgmr.msrb.gmra.mxu2 %v313_v9  ;;  %382 = vmatmul.f32.vlgmr.msrb.gmra.mxu3 %v313_v9 }
 0x2b4   :  { %575 = vmatpush.msra.mxu3 %v569_v8 }
 0x2b6   :  { %576 = vmatpush.msra.mxu3 %v568_v11 }
 0x2b8   :  { %577 = vmatpush.msra.mxu3 %v567_v14 }
 0x336   :  { %v868_v17 = vpop.f32.mrf.mxu3  ;;  %v363_v19 = vpop.f32.mrf.mxu2 }
 0x337   :  { %v386_v18 = vmul.f32 %v868_v17, %v868_v17  ;;  %v387_v20 = vmul.f32 %v363_v19, %v866_v39  ;;  %v873_v39 = vand.u32 127, %v427_v36 }
 0x339   :  { %420 = vmatmul.f32.vlgmr.msra.gmra.mxu0 %v386_v18  ;;  %vm429_vm2 = vcmp.lt.s32.totalorder %v873_v39, 3  ;;  %v566_v18 = vld [vmem:[#allocation7 + $0x3d0] sm:$0xff]  ;;  %vm593_vm10 = vcmp.ge.s32.totalorder %v873_v39, 4  ;;  %vm594_vm11 = vcmp.lt.s32.totalorder %v873_v39, 8  ;;  %vm599_vm13 = vcmp.eq.s32.totalorder %v873_v39, 8 }
 0x33a   :  { %578 = vmatpush.msra.mxu3 %v566_v18  ;;  %vm595_vm12 = vmand %vm593_vm10, %vm594_vm11  ;;  %vm601_vm14 = vcmp.eq.s32.totalorder %v873_v39, 9 }
 0x33c   :  { %579 = vmatpush.msra.mxu3 %v565_v21 }
 0x33e   :  { %580 = vmatpush.msra.mxu3 %v564_v23 }
 0x340   :  { %581 = vmatpush.msra.mxu3 %v563_v25 }
 0x341   :  { %423 = vmatmul.f32.gmra.mxu0 %v387_v20 }
 0x342   :  { %582 = vmatpush.msra.mxu3 %v562_v26 }
 0x344   :  { %583 = vmatpush.msra.mxu3 %v561_v27 }
 0x346   :  { %584 = vmatpush.msra.mxu3 %v560_v28 }
 0x348   :  { %585 = vmatpush.msra.mxu3 %v559_v33 }
 0x34a   :  { %586 = vmatpush.msra.mxu3 %v558_v35 }
 0x3b6   :  { %v421_v37 = vpop.f32.mrf.mxu0 }
 0x3b7   :  { %v460_v38 = vmax.f32 %v421_v37, 1e-24  ;;  %v557_v37 = vld [vmem:[#allocation7 + $0x388] sm:$0xff] }
 0x3b8   :  { %587 = vmatpush.msra.mxu3 %v557_v37 }
 0x3b9   :  { %643 = vrsqrt.f32 %v460_v38  ;;  %vm467_vm4 = vweird.f32 %v460_v38 }
 0x3be   :  { %v424_v40 = vpop.f32.mrf.mxu0 }
 0x3bf   :  { %v644_v41 = vpop.eup %643  ;;  %v430_v42 = vsel %vm429_vm2, %v424_v40, -1e+30 }
 0x3c0   :  { %v462_v43 = vmul.f32 %v644_v41, %v460_v38  ;;  %431 = vmax.xlane.f32.xlu0 %v430_v42  ;;  %vm468_vm3 = vweird.f32 %v644_v41  ;;  %v556_v38 = vld [vmem:[#allocation7 + $0x380] sm:$0xff] }
 0x3c1   :  { %vm469_vm5 = vmor %vm467_vm4, %vm468_vm3  ;;  %588 = vmatpush.msra.mxu3 %v556_v38 }
 0x3c2   :  { %v463_v44 = vmul.f32 %v644_v41, %v462_v43  ;;  %v642_v43 = vld [vmem:[#allocation10 + $0x5] ss:$0 sm:$0xff] }
 0x3c4   :  { %v464_v45 = vmul.f32 0.5, %v463_v44 }
 0x3c6   :  { %v465_v46 = vsub.f32 1.5, %v464_v45 }
 0x3c8   :  { %v466_v47 = vmul.f32 %v644_v41, %v465_v46 }
 0x3ca   :  { %v470_v48 = vsel %vm469_vm5, %v644_v41, %v466_v47 }
 0x3cb   :  { %503 = vmatmul.f32.vlgmr.msra.gmra.mxu1 %v470_v48 }
 0x433   :  { %v432_v61 = vpop.xlane.xlu0 %431 }
 0x434   :  { %v433_v62 = vsub.f32 %v430_v42, %v432_v61 }
 0x436   :  { %v434_v63 = vmul.f32 1.442695, %v433_v62 }
 0x438   :  { %645 = vpow2.f32 %v434_v63 }
 0x43e   :  { %v646_v0 = vpop.eup %645 }
 0x43f   :  { %436 = vadd.xlane.f32.xlu0 %v646_v0 }
 0x448   :  { %v504_v1 = vpop.f32.mrf.mxu1 }
 0x449   :  { %v510_v2 = vmul.f32 %v504_v1, %v868_v17 }
 0x44b   :  { %544 = vmatmul.f32.vlgmr.msra.gmra.mxu2 %v510_v2  ;;  %v551_v36 = vmul.f32 %v510_v2, %v510_v2 }
 0x4b2   :  { %v437_v3 = vpop.xlane.xlu0 %436 }
 0x4b3   :  { %647 = vrcp.f32 %v437_v3  ;;  %v449_v10 = vand.u32 2147483648, %v437_v3  ;;  %v447_v13 = vand.u32 2147483647, %v437_v3  ;;  %vm443_vm7 = vweird.f32 %v437_v3 }
 0x4b5   :  { %v450_v16 = vor.u32 1.1754944e-38, %v449_v10  ;;  %vm448_vm9 = vcmp.eq.f32.partialorder %v447_v13, 8.507059e+37 }
 0x4b9   :  { %v648_v4 = vpop.eup %647 }
 0x4ba   :  { %v439_v7 = vmul.f32 %v648_v4, %v437_v3  ;;  %vm444_vm6 = vweird.f32 %v648_v4 }
 0x4bb   :  { %vm445_vm8 = vmor %vm443_vm7, %vm444_vm6 }
 0x4bc   :  { %v440_v9 = vsub.f32 1.0, %v439_v7 }
 0x4be   :  { %v441_v12 = vmul.f32 %v648_v4, %v440_v9 }
 0x4c0   :  { %v442_v15 = vadd.f32 %v648_v4, %v441_v12 }
 0x4c2   :  { %v446_v19 = vsel %vm445_vm8, %v648_v4, %v442_v15 }
 0x4c3   :  { %v451_v20 = vsel %vm448_vm9, %v450_v16, %v446_v19 }
 0x4c4   :  { %v452_v22 = vmul.f32 %v646_v0, %v451_v20 }
 0x4c6   :  { %v453_v24 = vadd.f32 1e-06, %v452_v22  ;;  %506 = vmatmul.f32.gmra.mxu1 %v452_v22 }
 0x4c8   :  { %649 = vlog2.f32 %v453_v24 }
 0x4ce   :  { %v650_v29 = vpop.eup %649  ;;  %v545_v30 = vpop.f32.mrf.mxu2 }
 0x4cf   :  { %v548_v31 = vmul.f32 %v545_v30, %v545_v30  ;;  %v455_v32 = vmul.f32 0.6931472, %v650_v29 }
 0x4d1   :  { %549 = vadd.xlane.f32.xlu1 %v548_v31  ;;  %v456_v34 = vsel %vm429_vm2, %v455_v32, 0.0 }
 0x4d2   :  { %457 = vadd.xlane.f32.xlu2 %v456_v34 }
 0x4d9   :  { %552 = vadd.xlane.f32.xlu1 %v551_v36 }
 0x543   :  { %v507_v40 = vpop.f32.mrf.mxu1 }
 0x544   :  { %v511_v41 = vmul.f32 %v507_v40, %v868_v17  ;;  %v550_v42 = vpop.xlane.xlu1 %549 }
 0x545   :  { %v458_v47 = vpop.xlane.xlu2 %457 }
 0x546   :  { %589 = vmatmul.f32.vlgmr.msra.gmra.mxu3 %v511_v41  ;;  %v459_v17 = vmul.f32 -0.0033333334, %v458_v47 }
 0x54c   :  { %v553_v44 = vpop.xlane.xlu1 %552 }
 0x54d   :  { %v554_v48 = vsub.f32 %v550_v42, %v553_v44 }
 0x54f   :  { %v555_v51 = vmul.f32 0.5, %v554_v48 }
 0x5c9   :  { %v590_v45 = vpop.f32.mrf.mxu3 }
 0x5ca   :  { %v591_v46 = vadd.f32 %v642_v43, %v590_v45 }
 0x5cc   :  { %v596_v49 = vmax.f32 %v591_v46, -20.0 }
 0x5ce   :  { %v597_v50 = vmin.f32 %v596_v49, 2.0 }
 0x5d0   :  { %v598_v52 = vsel %vm595_vm12, %v597_v50, %v591_v46 }
 0x5d1   :  { %v600_v53 = vsel %vm599_vm13, %v459_v17, %v598_v52 }
 0x5d2   :  { %v602_v54 = vsel %vm601_vm14, %v555_v51, %v600_v53 }
 0x5d3   :  { %603 = vst [vmem:[#allocation11] sm:$0xff] %v602_v54 }
 0x5d4   :  { %614 = dma.vmem_to_hbm [thread:$0]  %s610_s4, 128, %s612_s21, [#allocation4]  }
 0x5d5   :  { %801 = dma.done.wait [#allocation4], 128  }
 0x5d6   :  { %802 = vsyncadd [#allocation4], 4294967168 }
 0x5d7   :  { %619 = vsyncpa [#allocation3], 1 }
 0x5d8   :  { %620 = vsyncpa [#allocation6], 1 }
 0x5d9   :  { %621 = vsyncpa [#allocation9], 1 }
 0x5da   :  { %622 = vsyncpa [#allocation4], 1 }

</bundles_post_ra>
